<compile_context>
chip_gen: v6e
topology: v6e:2x2x1
jax: 0.10.0
libtpu: 0.0.40
codegen_flags: <defaults>
</compile_context>

<pallas_src>
import functools

import jax
import jax.numpy as jnp
from jax.experimental import pallas as pl
from jax.experimental.pallas import tpu as pltpu


def _round_up(a: int, m: int) -> int:
    return ((a + m - 1) // m) * m


def _slc_kernel(x_ref, w_ref, b_ref, gamma_ref, beta_ref, *rest,
                eps: float, dropout_p: float):
    # x_ref: (TM, H) rows; w_ref: (H, H); b/gamma/beta: (1, H)
    # rest = (bits_ref, o_ref) when dropout_p > 0 else (o_ref,)
    if dropout_p > 0.0:
        bits_ref, o_ref = rest
    else:
        (o_ref,) = rest

    x = x_ref[...].astype(jnp.float32)
    h = x.shape[-1]

    # ---- LayerNorm (PyTorch semantics: unbiased std, eps added to std) ----
    mean = jnp.mean(x, axis=-1, keepdims=True)
    diff = x - mean
    var_unbiased = jnp.sum(diff * diff, axis=-1, keepdims=True) * (1.0 / (h - 1))
    std = jnp.sqrt(var_unbiased)
    inv = 1.0 / (std + eps)                      # one divide per row (TM,1)
    normed = gamma_ref[...].astype(jnp.float32) * (diff * inv) \
        + beta_ref[...].astype(jnp.float32)

    # ---- Sublayer: Linear(H -> H) on the MXU ----
    y = jnp.dot(normed.astype(w_ref.dtype), w_ref[...],
                preferred_element_type=jnp.float32)
    y = y + b_ref[...].astype(jnp.float32)

    # ---- Dropout (inverted dropout, integer-threshold compare) ----
    if dropout_p > 0.0:
        thresh = min(int(round(dropout_p * (2 ** 32))), 2 ** 32 - 1)
        keep = bits_ref[...] >= jnp.uint32(thresh)      # P(keep) = 1 - p
        y = jnp.where(keep, y * (1.0 / (1.0 - dropout_p)), 0.0)

    # ---- Residual connection ----
    o_ref[...] = (x + y).astype(o_ref.dtype)


def sublayer_connection(x, w, b, gamma, beta, *, eps=1e-6, dropout_p=0.0,
                        rng_key=None, tile_rows=512):
    """x: (B, S, H). Returns (B, S, H) = x + dropout(Linear(LayerNorm(x)))."""
    B, S, H = x.shape
    T = B * S

    # Effective row tile: large for MXU/HBM efficiency, but no bigger than the
    # (8-rounded) problem.  Remainder rows are handled by zero-padding.
    tm = max(8, min(int(tile_rows), _round_up(T, 8)))
    tm = _round_up(tm, 8)
    T_pad = _round_up(T, tm)
    grid = (T_pad // tm,)

    x2 = x.reshape(T, H)
    if T_pad != T:
        x2 = jnp.pad(x2, ((0, T_pad - T), (0, 0)))
    b2 = b.reshape(1, H)
    g2 = gamma.reshape(1, H)
    be2 = beta.reshape(1, H)

    kernel = functools.partial(_slc_kernel, eps=eps, dropout_p=float(dropout_p))

    row_spec = pl.BlockSpec((tm, H), lambda i: (i, 0))
    in_specs = [
        row_spec,                                      # x rows (streamed)
        pl.BlockSpec((H, H), lambda i: (0, 0)),        # W (resident)
        pl.BlockSpec((1, H), lambda i: (0, 0)),        # bias
        pl.BlockSpec((1, H), lambda i: (0, 0)),        # gamma
        pl.BlockSpec((1, H), lambda i: (0, 0)),        # beta
    ]
    operands = [x2, w, b2, g2, be2]

    if dropout_p > 0.0:
        if rng_key is None:
            rng_key = jax.random.PRNGKey(0)
        bits = jax.random.bits(rng_key, (T_pad, H), dtype=jnp.uint32)
        in_specs.append(row_spec)                      # dropout bits (streamed)
        operands.append(bits)

    # VMEM budget: double-buffered row streams + resident W + f32 temps.
    itemsize = jnp.dtype(x.dtype).itemsize
    n_streams = 3 if dropout_p > 0.0 else 2            # x, out, (bits)
    vmem_bytes = (2 * n_streams * tm * H * itemsize    # pipelined row streams
                  + 2 * H * H * jnp.dtype(w.dtype).itemsize   # W buffers
                  + 6 * tm * H * 4)                     # f32 temporaries
    vmem_limit = min(max(2 * vmem_bytes, 32 * 1024 * 1024), 64 * 1024 * 1024)

    cost = pl.CostEstimate(
        flops=2 * T_pad * H * H + 10 * T_pad * H,
        transcendentals=T_pad,                          # sqrt per row
        bytes_accessed=(n_streams * T_pad * H * itemsize
                        + H * H * jnp.dtype(w.dtype).itemsize
                        + 3 * H * 4),
    )

    out = pl.pallas_call(
        kernel,
        out_shape=jax.ShapeDtypeStruct((T_pad, H), x.dtype),
        grid=grid,
        in_specs=in_specs,
        out_specs=row_spec,
        compiler_params=pltpu.CompilerParams(
            dimension_semantics=("parallel",),          # rows are independent
            vmem_limit_bytes=int(vmem_limit),
        ),
        cost_estimate=cost,
    )(*operands)

    if T_pad != T:
        out = out[:T]
    return out.reshape(B, S, H)


def _reference_no_dropout(x, w, b, gamma, beta, eps=1e-6):
    """Pure-JAX reference of x + Linear(LayerNorm(x)) (eval mode, p=0)."""
    mean = jnp.mean(x, axis=-1, keepdims=True)
    diff = x - mean
    std = jnp.sqrt(jnp.sum(diff * diff, axis=-1, keepdims=True) / (x.shape[-1] - 1))
    normed = gamma * diff / (std + eps) + beta
    y = jnp.einsum("bsh,hk->bsk", normed, w) + b
    return x + y


if __name__ == "__main__":
    key = jax.random.PRNGKey(0)
    kx, kw, kb, kd = jax.random.split(key, 4)

    B, S, H = 2, 8, 128  # batch, seq, hidden
    x = jax.random.normal(kx, (B, S, H), dtype=jnp.float32)

    # Deterministic parameter init (synthetic; matches module shapes).
    gamma = jnp.ones((H,), dtype=jnp.float32)                    # LayerNorm a_2
    beta = jnp.zeros((H,), dtype=jnp.float32)                    # LayerNorm b_2
    w = jax.random.normal(kw, (H, H), dtype=jnp.float32) * 0.02  # sublayer Linear
    b = jax.random.normal(kb, (H,), dtype=jnp.float32) * 0.02

    # 1) eval-mode (dropout=0) — check against pure-JAX reference.
    out_eval = sublayer_connection(x, w, b, gamma, beta, dropout_p=0.0)
    out_eval = jax.block_until_ready(out_eval)
    ref = _reference_no_dropout(x, w, b, gamma, beta)
    assert jnp.allclose(out_eval, ref, atol=1e-4, rtol=1e-4), "mismatch vs reference"

    # 2) training-mode dropout path (deterministic given rng_key).
    out_train = sublayer_connection(x, w, b, gamma, beta, dropout_p=0.1, rng_key=kd)
    out_train = jax.block_until_ready(out_train)
    assert out_train.shape == (B, S, H)
    assert bool(jnp.all(jnp.isfinite(out_train)))

    print("KERNEL_OK")
</pallas_src>

<mosaic_0001>
module attributes {stable_mosaic.version = 11 : i64} {
  func.func @_slc_kernel(%arg0: i32, %arg1: memref<16x128xf32, #tpu.memory_space<vmem>>, %arg2: memref<128x128xf32, #tpu.memory_space<vmem>>, %arg3: memref<1x128xf32, #tpu.memory_space<vmem>>, %arg4: memref<1x128xf32, #tpu.memory_space<vmem>>, %arg5: memref<1x128xf32, #tpu.memory_space<vmem>>, %arg6: memref<16x128xf32, #tpu.memory_space<vmem>>) attributes {dimension_semantics = [#tpu.dimension_semantics<parallel>], iteration_bounds = array<i64: 1>, scalar_prefetch = 0 : i64, scratch_operands = 0 : i64, tpu.core_type = #tpu.core_type<tc>, window_params = [{transform_indices = @transform_0, window_bounds = array<i64: 16, 128>}, {pipeline_mode = #tpu.pipeline_mode<synchronous>, transform_indices = @transform_1, window_bounds = array<i64: 128, 128>}, {pipeline_mode = #tpu.pipeline_mode<synchronous>, transform_indices = @transform_2, window_bounds = array<i64: 1, 128>}, {pipeline_mode = #tpu.pipeline_mode<synchronous>, transform_indices = @transform_3, window_bounds = array<i64: 1, 128>}, {pipeline_mode = #tpu.pipeline_mode<synchronous>, transform_indices = @transform_4, window_bounds = array<i64: 1, 128>}, {transform_indices = @transform_5, window_bounds = array<i64: 16, 128>}]} {
    %c0 = arith.constant 0 : index
    %c0_0 = arith.constant 0 : index
    %0 = vector.load %arg1[%c0, %c0_0] : memref<16x128xf32, #tpu.memory_space<vmem>>, vector<16x128xf32>
    %cst = arith.constant dense<0.000000e+00> : vector<16xf32>
    %1 = vector.multi_reduction <add>, %0, %cst [1] : vector<16x128xf32> to vector<16xf32>
    %2 = vector.shape_cast %1 : vector<16xf32> to vector<16x1xf32>
    %cst_1 = arith.constant 1.280000e+02 : f32
    %3 = vector.broadcast %cst_1 : f32 to vector<16x1xf32>
    %4 = arith.divf %2, %3 : vector<16x1xf32>
    %5 = vector.broadcast %4 : vector<16x1xf32> to vector<16x128xf32>
    %6 = arith.subf %0, %5 : vector<16x128xf32>
    %7 = arith.mulf %6, %6 : vector<16x128xf32>
    %cst_2 = arith.constant dense<0.000000e+00> : vector<16xf32>
    %8 = vector.multi_reduction <add>, %7, %cst_2 [1] : vector<16x128xf32> to vector<16xf32>
    %9 = vector.shape_cast %8 : vector<16xf32> to vector<16x1xf32>
    %cst_3 = arith.constant 0.00787401571 : f32
    %10 = vector.broadcast %cst_3 : f32 to vector<16x1xf32>
    %11 = arith.mulf %9, %10 : vector<16x1xf32>
    %12 = math.sqrt %11 : vector<16x1xf32>
    %cst_4 = arith.constant 9.99999997E-7 : f32
    %13 = vector.broadcast %cst_4 : f32 to vector<16x1xf32>
    %14 = arith.addf %12, %13 : vector<16x1xf32>
    %cst_5 = arith.constant 1.000000e+00 : f32
    %15 = vector.broadcast %cst_5 : f32 to vector<16x1xf32>
    %16 = arith.divf %15, %14 : vector<16x1xf32>
    %c0_6 = arith.constant 0 : index
    %c0_7 = arith.constant 0 : index
    %17 = vector.load %arg4[%c0_6, %c0_7] : memref<1x128xf32, #tpu.memory_space<vmem>>, vector<1x128xf32>
    %18 = vector.broadcast %16 : vector<16x1xf32> to vector<16x128xf32>
    %19 = arith.mulf %6, %18 : vector<16x128xf32>
    %20 = vector.broadcast %17 : vector<1x128xf32> to vector<16x128xf32>
    %21 = arith.mulf %20, %19 : vector<16x128xf32>
    %c0_8 = arith.constant 0 : index
    %c0_9 = arith.constant 0 : index
    %22 = vector.load %arg5[%c0_8, %c0_9] : memref<1x128xf32, #tpu.memory_space<vmem>>, vector<1x128xf32>
    %23 = vector.broadcast %22 : vector<1x128xf32> to vector<16x128xf32>
    %24 = arith.addf %21, %23 : vector<16x128xf32>
    %c0_10 = arith.constant 0 : index
    %c0_11 = arith.constant 0 : index
    %25 = vector.load %arg2[%c0_10, %c0_11] : memref<128x128xf32, #tpu.memory_space<vmem>>, vector<128x128xf32>
    %cst_12 = arith.constant dense<0.000000e+00> : vector<16x128xf32>
    %26 = tpu.matmul %24, %25, %cst_12 {dimension_numbers = #tpu.dot_dimension_numbers<[1], [0], [0], [1], [0, 0, 1, 1], [], []>} : vector<16x128xf32>, vector<128x128xf32>, vector<16x128xf32> -> vector<16x128xf32>
    %c0_13 = arith.constant 0 : index
    %c0_14 = arith.constant 0 : index
    %27 = vector.load %arg3[%c0_13, %c0_14] : memref<1x128xf32, #tpu.memory_space<vmem>>, vector<1x128xf32>
    %28 = vector.broadcast %27 : vector<1x128xf32> to vector<16x128xf32>
    %29 = arith.addf %26, %28 : vector<16x128xf32>
    %30 = arith.addf %0, %29 : vector<16x128xf32>
    %c0_15 = arith.constant 0 : index
    %c0_16 = arith.constant 0 : index
    %31 = vector.load %arg6[%c0_15, %c0_16] : memref<16x128xf32, #tpu.memory_space<vmem>>, vector<16x128xf32>
    tpu.vector_store %arg6[%c0_15, %c0_16], %30 {strides = array<i32>} : memref<16x128xf32, #tpu.memory_space<vmem>>, vector<16x128xf32>,
    return
  }
  func.func @transform_0(%arg0: i32) -> (i32, i32) {
    %c0_i32 = arith.constant 0 : i32
    %c0_i32_0 = arith.constant 0 : i32
    return %arg0, %c0_i32 : i32, i32
  }
  func.func @transform_1(%arg0: i32) -> (i32, i32) {
    %c0_i32 = arith.constant 0 : i32
    %c0_i32_0 = arith.constant 0 : i32
    %c0_i32_1 = arith.constant 0 : i32
    return %c0_i32, %c0_i32_0 : i32, i32
  }
  func.func @transform_2(%arg0: i32) -> (i32, i32) {
    %c0_i32 = arith.constant 0 : i32
    %c0_i32_0 = arith.constant 0 : i32
    %c0_i32_1 = arith.constant 0 : i32
    return %c0_i32, %c0_i32_0 : i32, i32
  }
  func.func @transform_3(%arg0: i32) -> (i32, i32) {
    %c0_i32 = arith.constant 0 : i32
    %c0_i32_0 = arith.constant 0 : i32
    %c0_i32_1 = arith.constant 0 : i32
    return %c0_i32, %c0_i32_0 : i32, i32
  }
  func.func @transform_4(%arg0: i32) -> (i32, i32) {
    %c0_i32 = arith.constant 0 : i32
    %c0_i32_0 = arith.constant 0 : i32
    %c0_i32_1 = arith.constant 0 : i32
    return %c0_i32, %c0_i32_0 : i32, i32
  }
  func.func @transform_5(%arg0: i32) -> (i32, i32) {
    %c0_i32 = arith.constant 0 : i32
    %c0_i32_0 = arith.constant 0 : i32
    return %arg0, %c0_i32 : i32, i32
  }
}

</mosaic_0001>

<bundles_post_ra>
// kernel: tpu_custom_call.1
= control target key start
LH: loop header
LB: loop body
LE: loop exit
PB: predicated region body
PF: predicated region fallthrough
CT: control target
= control target key end

     0   :  { %10 = vsyncpa [#allocation3], 0  ;;  %s445_s0 = inlined_call_operand.hbm [shape: f32[16,128], index: 0, kind: input, shape index: {}]   ;;  %s446_s1 = inlined_call_operand.hbm [shape: f32[128,128], index: 1, kind: input, shape index: {}]   ;;  %s447_s2 = inlined_call_operand.vmem [shape: f32[1,128], index: 2, kind: input, shape index: {}]   ;;  %s448_s3 = inlined_call_operand.vmem [shape: f32[1,128], index: 3, kind: input, shape index: {}]   ;;  %s449_s4 = inlined_call_operand.vmem [shape: f32[1,128], index: 4, kind: input, shape index: {}]   ;;  %s450_s5 = inlined_call_operand.hbm [shape: f32[16,128], index: 5, kind: output, shape index: {}]  }
   0x1   :  { %11 = vsyncpa [#allocation6], 0 }
   0x2   :  { %12 = vsyncpa [#allocation4], 0  ;;  %s363_s18 = smov [#allocation2]  }
   0x3   :  { %s18_s19 = sshll.u32 %s363_s18, 4  ;;  %s19_s19 = int_to_ptr.vmem [resolvable:$true] %s18_s19 }
   0x4   :  { %s305_s20 = scalar_lea.vmem %s19_s19, 256  ;;  %p310_p1 = scmp.lt.s32.totalorder %s19_s19, %s19_s19 }
   0x5   :  { %p306_p0 = scmp.ne.s32.totalorder %s19_s19, %s305_s20  ;;  %p311_p2 = scmp.lt.s32.totalorder %s305_s20, %s305_s20 }
   0x7   :  { %p312_p3 = por %p311_p2, %p310_p1 }
   0x9   :  { %p313_p4 = pnand %p312_p3, %p306_p0 }
   0xb   :  { %316 = shalt.err (!%p313_p4)
}
   0xc   :  { %s364_s21 = smov 128   ;;  %s365_s22 = smov 8  }
   0xd   :  { %24 = dma.hbm_to_vmem [thread:$0]  %s445_s0, 256, %s19_s19, [#allocation3], %s364_s21, %s364_s21, %s365_s22  }
   0xe   :  { %s366_s25 = smov [#allocation5]  }
   0xf   :  { %s30_s26 = sshll.u32 %s366_s25, 4  ;;  %s31_s26 = int_to_ptr.vmem [resolvable:$true] %s30_s26 }
  0x10   :  { %s325_s27 = scalar_lea.vmem %s31_s26, 2048  ;;  %p330_p6 = scmp.lt.s32.totalorder %s31_s26, %s31_s26 }
  0x11   :  { %p326_p5 = scmp.ne.s32.totalorder %s31_s26, %s325_s27  ;;  %p331_p7 = scmp.lt.s32.totalorder %s325_s27, %s325_s27 }
  0x13   :  { %p332_p8 = por %p331_p7, %p330_p6 }
  0x15   :  { %p333_p9 = pnand %p332_p8, %p326_p5 }
  0x17   :  { %336 = shalt.err (!%p333_p9)
}
  0x18   :  { %36 = dma.hbm_to_vmem [thread:$0]  %s446_s1, 2048, %s31_s26, [#allocation6], %s364_s21, %s364_s21, %s365_s22  }
  0x19   :  { %357 = dma.done.wait [#allocation3], 256  }
  0x1a   :  { %358 = vsyncadd [#allocation3], 4294967040 }
  0x1b   :  { %359 = dma.done.wait [#allocation6], 2048  }
  0x1c   :  { %360 = vsyncadd [#allocation6], 4294965248  ;;  %v410_v0 = vld [vmem:[#allocation2] sm:$0xff]  ;;  %v413_v1 = vld [vmem:[#allocation2 + $0x8] sm:$0xff] }
  0x1d   :  { %51 = vadd.xlane.f32.xlu0 %v410_v0  ;;  %v123_v10 = vld [vmem:[#allocation5 + $0x78] sm:$0xff]  ;;  %v122_v11 = vld [vmem:[#allocation5 + $0x70] sm:$0xff]  ;;  %v121_v12 = vld [vmem:[#allocation5 + $0x68] sm:$0xff] }
  0x1e   :  { %249 = vmatprep.subr.mxu0 %v123_v10  ;;  %v120_v13 = vld [vmem:[#allocation5 + $0x60] sm:$0xff]  ;;  %v119_v14 = vld [vmem:[#allocation5 + $0x58] sm:$0xff]  ;;  %v118_v15 = vld [vmem:[#allocation5 + $0x50] sm:$0xff] }
  0x1f   :  { %250 = vmatpush3.msra.mxu0 %v123_v10  ;;  %v117_v16 = vld [vmem:[#allocation5 + $0x48] sm:$0xff]  ;;  %v116_v17 = vld [vmem:[#allocation5 + $0x40] sm:$0xff]  ;;  %v115_v18 = vld [vmem:[#allocation5 + $0x38] sm:$0xff] }
  0x20   :  { %251 = vmatprep.subr.mxu0 %v122_v11  ;;  %v114_v19 = vld [vmem:[#allocation5 + $0x30] sm:$0xff]  ;;  %v113_v20 = vld [vmem:[#allocation5 + $0x28] sm:$0xff]  ;;  %v112_v21 = vld [vmem:[#allocation5 + $0x20] sm:$0xff] }
  0x21   :  { %53 = vadd.xlane.f32.xlu0 %v413_v1  ;;  %252 = vmatpush3.msra.mxu0 %v122_v11  ;;  %v111_v22 = vld [vmem:[#allocation5 + $0x18] sm:$0xff]  ;;  %v110_v23 = vld [vmem:[#allocation5 + $0x10] sm:$0xff]  ;;  %v109_v24 = vld [vmem:[#allocation5 + $0x8] sm:$0xff] }
  0x22   :  { %253 = vmatprep.subr.mxu0 %v121_v12  ;;  %v108_v25 = vld [vmem:[#allocation5] sm:$0xff]  ;;  %v228_v43 = vld [vmem:[%s448_s3] ss:$0 sm:$0xff]  ;;  %s367_s3 = smov [#allocation7]  }
  0x23   :  { %254 = vmatpush3.msra.mxu0 %v121_v12  ;;  %v229_v45 = vld [vmem:[%s449_s4] ss:$0 sm:$0xff]  ;;  %s215_s9 = sshll.u32 %s367_s3, 4  ;;  %s216_s9 = int_to_ptr.vmem [resolvable:$true] %s215_s9 }
  0x24   :  { %255 = vmatprep.subr.mxu0 %v120_v13  ;;  %v230_v52 = vld [vmem:[%s447_s2] ss:$0 sm:$0xff]  ;;  %s337_s4 = scalar_lea.vmem %s216_s9, 256  ;;  %p342_p11 = scmp.lt.s32.totalorder %s216_s9, %s216_s9 }
  0x25   :  { %256 = vmatpush3.msra.mxu0 %v120_v13  ;;  %p338_p10 = scmp.ne.s32.totalorder %s216_s9, %s337_s4  ;;  %p343_p12 = scmp.lt.s32.totalorder %s337_s4, %s337_s4 }
  0x26   :  { %257 = vmatprep.subr.mxu0 %v119_v14 }
  0x27   :  { %258 = vmatpush3.msra.mxu0 %v119_v14  ;;  %p344_p13 = por %p343_p12, %p342_p11 }
  0x28   :  { %259 = vmatprep.subr.mxu0 %v118_v15 }
  0x29   :  { %260 = vmatpush3.msra.mxu0 %v118_v15  ;;  %p345_p0 = pnand %p344_p13, %p338_p10 }
  0x2a   :  { %261 = vmatprep.subr.mxu0 %v117_v16 }
  0x2b   :  { %262 = vmatpush3.msra.mxu0 %v117_v16 }
  0x2c   :  { %263 = vmatprep.subr.mxu0 %v116_v17 }
  0x2d   :  { %264 = vmatpush3.msra.mxu0 %v116_v17 }
  0x2e   :  { %265 = vmatprep.subr.mxu0 %v115_v18 }
  0x2f   :  { %266 = vmatpush3.msra.mxu0 %v115_v18 }
  0x30   :  { %267 = vmatprep.subr.mxu0 %v114_v19 }
  0x31   :  { %268 = vmatpush3.msra.mxu0 %v114_v19 }
  0x32   :  { %269 = vmatprep.subr.mxu0 %v113_v20 }
  0x33   :  { %270 = vmatpush3.msra.mxu0 %v113_v20 }
  0x34   :  { %271 = vmatprep.subr.mxu0 %v112_v21 }
  0x35   :  { %272 = vmatpush3.msra.mxu0 %v112_v21 }
  0x36   :  { %273 = vmatprep.subr.mxu0 %v111_v22 }
  0x37   :  { %274 = vmatpush3.msra.mxu0 %v111_v22 }
  0x38   :  { %275 = vmatprep.subr.mxu0 %v110_v23 }
  0x39   :  { %276 = vmatpush3.msra.mxu0 %v110_v23 }
  0x3a   :  { %277 = vmatprep.subr.mxu0 %v109_v24 }
  0x3b   :  { %278 = vmatpush3.msra.mxu0 %v109_v24 }
  0x3c   :  { %279 = vmatprep.subr.mxu0 %v108_v25 }
  0x3d   :  { %280 = vmatpush3.msra.mxu0 %v108_v25 }
  0xa6   :  { %v52_v2 = vpop.xlane.xlu0 %51 }
  0xa7   :  { %v56_v3 = vmul.f32 0.0078125, %v52_v2 }
  0xa9   :  { %v417_v4 = vsub.f32 %v410_v0, %v56_v3 }
  0xaa   :  { %v54_v5 = vpop.xlane.xlu0 %53 }
  0xab   :  { %v57_v6 = vmul.f32 0.0078125, %v54_v5  ;;  %v60_v7 = vmul.f32 %v417_v4, %v417_v4 }
  0xad   :  { %v422_v8 = vsub.f32 %v413_v1, %v57_v6  ;;  %62 = vadd.xlane.f32.xlu1 %v60_v7 }
  0xaf   :  { %v61_v9 = vmul.f32 %v422_v8, %v422_v8 }
  0xb1   :  { %64 = vadd.xlane.f32.xlu1 %v61_v9 }
 0x136   :  { %v63_v26 = vpop.xlane.xlu1 %62 }
 0x137   :  { %v66_v27 = vmul.f32 0.007874016, %v63_v26 }
 0x139   :  { %289 = vrsqrt.f32 %v66_v27  ;;  %vm70_vm0 = vcmp.eq.f32.partialorder %v66_v27, inf  ;;  %v73_v32 = vand.u32 2147483648, %v66_v27  ;;  %vm72_vm1 = vcmp.eq.f32.partialorder %v66_v27, 0.0 }
 0x13a   :  { %v65_v28 = vpop.xlane.xlu1 %64 }
 0x13b   :  { %v67_v29 = vmul.f32 0.007874016, %v65_v28 }
 0x13d   :  { %291 = vrsqrt.f32 %v67_v29  ;;  %vm77_vm2 = vcmp.eq.f32.partialorder %v67_v29, inf  ;;  %v80_v38 = vand.u32 2147483648, %v67_v29  ;;  %vm79_vm3 = vcmp.eq.f32.partialorder %v67_v29, 0.0 }
 0x146   :  { %v290_v30 = vpop.eup %289 }
 0x147   :  { %v69_v31 = vmul.f32 %v290_v30, %v66_v27 }
 0x149   :  { %v71_v33 = vsel %vm70_vm0, %v66_v27, %v69_v31 }
 0x14a   :  { %v292_v34 = vpop.eup %291  ;;  %v74_v35 = vsel %vm72_vm1, %v73_v32, %v71_v33 }
 0x14b   :  { %v76_v36 = vmul.f32 %v292_v34, %v67_v29  ;;  %v82_v37 = vadd.f32 1e-06, %v74_v35 }
 0x14d   :  { %v78_v39 = vsel %vm77_vm2, %v67_v29, %v76_v36  ;;  %293 = vrcp.f32 %v82_v37 }
 0x14e   :  { %v81_v40 = vsel %vm79_vm3, %v80_v38, %v78_v39 }
 0x14f   :  { %v83_v41 = vadd.f32 1e-06, %v81_v40 }
 0x151   :  { %295 = vrcp.f32 %v83_v41 }
 0x15a   :  { %v294_v42 = vpop.eup %293 }
 0x15b   :  { %v89_v44 = vmul.f32 %v294_v42, %v417_v4 }
 0x15d   :  { %v97_v46 = vmul.f32 %v228_v43, %v89_v44 }
 0x15e   :  { %v296_v47 = vpop.eup %295 }
 0x15f   :  { %v90_v48 = vmul.f32 %v296_v47, %v422_v8  ;;  %v106_v49 = vadd.f32 %v229_v45, %v97_v46 }
 0x161   :  { %v98_v50 = vmul.f32 %v228_v43, %v90_v48  ;;  %281 = vmatprep.mubr.f32.mxu0 %v106_v49 }
 0x163   :  { %v107_v51 = vadd.f32 %v229_v45, %v98_v50 }
 0x165   :  { %282 = vmatmul.mubr.f32.vlgmr.msra.gmra.mxu0 %v107_v51 }
 0x225   :  { %v283_v53 = vpop.f32.mrf.mxu0 }
 0x226   :  { %v203_v54 = vadd.f32 %v283_v53, %v230_v52 }
 0x227   :  { %v197_v55 = vpop.f32.mrf.mxu0 }
 0x228   :  { %v207_v56 = vadd.f32 %v203_v54, %v413_v1  ;;  %v198_v57 = vadd.f32 %v230_v52, %v197_v55 }
 0x22a   :  { %209 = vst [vmem:[#allocation7 + $0x8] sm:$0xff] %v207_v56  ;;  %v206_v58 = vadd.f32 %v198_v57, %v410_v0 }
 0x22c   :  { %208 = vst [vmem:[#allocation7] sm:$0xff] %v206_v58 }
 0x22d   :  { %348 = shalt.err (!%p345_p0)
}
 0x22e   :  { %221 = dma.vmem_to_hbm [thread:$0]  %s216_s9, 256, %s450_s5, [#allocation4], %s364_s21, %s364_s21, %s365_s22  }
 0x22f   :  { %361 = dma.done.wait [#allocation4], 256  }
 0x230   :  { %362 = vsyncadd [#allocation4], 4294967040 }
 0x231   :  { %225 = vsyncpa [#allocation3], 1 }
 0x232   :  { %226 = vsyncpa [#allocation6], 1 }
 0x233   :  { %227 = vsyncpa [#allocation4], 1 }

</bundles_post_ra>
